<compile_context>
chip_gen: v7x
topology: tpu7x:2x2x1
jax: 0.10.0
libtpu: 0.0.40
codegen_flags: <defaults>
</compile_context>

<pallas_src>
import jax
import jax.numpy as jnp
from jax.experimental import pallas as pl
from jax.experimental.pallas import tpu as pltpu


def _round_up(n, m):
    return ((n + m - 1) // m) * m


def _choose_tiles(R, T, itemsize):
    """Pick (r_block, t_block) targeting ~2 MiB of x per tile."""
    LANE = 128
    sub = max(8, 32 // itemsize)              # f32: 8, bf16/f16: 16, int8/fp8: 32
    target_elems = (2 * 1024 * 1024) // itemsize

    # Row tile: as many rows as the byte target allows against a 2048-wide
    # lane tile, in multiples of the packing granularity, clamped to R.
    r_block = max(sub, min((target_elems // 2048) // sub * sub, _round_up(R, sub)))
    if r_block >= R:
        r_block = R                           # whole axis -> always a legal block

    # Lane tile: fill the remaining byte budget, multiple of 128, whole axis
    # if it fits; capped at 8192 so long-T shapes still give several blocks
    # (pipelining + both v7x TensorCores).
    t_block = max(LANE, (target_elems // max(r_block, sub)) // LANE * LANE)
    t_block = min(t_block, 8192)
    if t_block >= T:
        t_block = T                           # whole axis -> always legal
    return r_block, t_block


def _snake_beta_kernel(a2_ref, hib_ref, x_ref, o_ref):
    # a2_ref / hib_ref: (r_block, 1) f32 per-row constants
    #   a2  = 2 * alpha_eff
    #   hib = 0.5 / (beta_eff + eps)
    # x_ref / o_ref:    (r_block, t_block) in the I/O dtype.
    a2 = a2_ref[...]
    hib = hib_ref[...]
    x = x_ref[...].astype(jnp.float32)
    # x + sin(a*x)^2 / (b+eps)  ==  x + hib * (1 - cos(a2*x))
    y = x + hib - hib * jnp.cos(a2 * x)
    o_ref[...] = y.astype(o_ref.dtype)


def snake_beta(x, alpha, beta, *, alpha_logscale=False, eps=1e-9,
               r_block=None, t_block=None):
    """SnakeBeta forward.  x: (B, C, T); alpha, beta: (C,)."""
    B, C, T = x.shape
    dtype = x.dtype
    itemsize = jnp.dtype(dtype).itemsize
    R = B * C

    # Per-channel constants, computed once in the wrapper (O(C) work).
    a = jnp.asarray(alpha, jnp.float32)
    b = jnp.asarray(beta, jnp.float32)
    if alpha_logscale:
        a = jnp.exp(a)
        b = jnp.exp(b)
    a2 = 2.0 * a
    hib = 0.5 / (b + eps)

    # Collapse (B, C) into rows (free reshape for contiguous x); per-row
    # params are the channel params tiled B times (row r holds channel r % C).
    x2d = x.reshape(R, T)
    a2_rows = jnp.tile(a2, B).reshape(R, 1)
    hib_rows = jnp.tile(hib, B).reshape(R, 1)

    rb, tb = _choose_tiles(R, T, itemsize)
    # Optional overrides (assumed sublane/lane aligned or equal to full dims).
    if r_block is not None:
        rb = min(r_block, R)
    if t_block is not None:
        tb = min(t_block, T)

    grid = (pl.cdiv(R, rb), pl.cdiv(T, tb))

    # VMEM budget from the actual tile footprint: double-buffered in + out
    # (4 x tile) plus f32 compute temporaries; clamped so it stays well inside
    # v7x's 64 MiB physical VMEM and never below the default scoped limit.
    tile_bytes = rb * tb * itemsize
    tile_f32_bytes = rb * tb * 4
    vmem_limit = int(min(max(4 * tile_bytes + 4 * tile_f32_bytes + (2 << 20),
                             16 << 20), 48 << 20))

    cost = pl.CostEstimate(
        flops=4 * R * T,
        transcendentals=R * T,
        bytes_accessed=2 * R * T * itemsize + 8 * R,
    )

    out = pl.pallas_call(
        _snake_beta_kernel,
        out_shape=jax.ShapeDtypeStruct((R, T), dtype),
        grid_spec=pltpu.PrefetchScalarGridSpec(
            num_scalar_prefetch=0,
            grid=grid,
            in_specs=[
                pl.BlockSpec((rb, 1), lambda r, t: (r, 0)),    # a2 (resident per row-block)
                pl.BlockSpec((rb, 1), lambda r, t: (r, 0)),    # hib
                pl.BlockSpec((rb, tb), lambda r, t: (r, t)),   # x
            ],
            out_specs=pl.BlockSpec((rb, tb), lambda r, t: (r, t)),
        ),
        compiler_params=pltpu.CompilerParams(
            dimension_semantics=("parallel", "parallel"),
            vmem_limit_bytes=vmem_limit,
        ),
        cost_estimate=cost,
    )(a2_rows, hib_rows, x2d)

    return out.reshape(B, C, T)


def snake_beta_ref(x, alpha, beta, *, alpha_logscale=False, eps=1e-9):
    # Pure-JAX reference with the original sin^2 formulation (PyTorch semantics).
    a = jnp.asarray(alpha, jnp.float32)[None, :, None]
    b = jnp.asarray(beta, jnp.float32)[None, :, None]
    if alpha_logscale:
        a = jnp.exp(a)
        b = jnp.exp(b)
    xf = x.astype(jnp.float32)
    return (xf + 1.0 / (b + eps) * jnp.sin(xf * a) ** 2).astype(x.dtype)


if __name__ == "__main__":
    key = jax.random.PRNGKey(0)
    k0, k1, k2, k3 = jax.random.split(key, 4)

    # Small shapes consistent with the module: x (B, C, T), params (C,).
    B, C, T = 2, 4, 16
    x = jax.random.normal(k0, (B, C, T), dtype=jnp.float32)
    alpha = jnp.ones((C,), jnp.float32)     # SnakeBeta default init (non-logscale)
    beta = jnp.ones((C,), jnp.float32)

    out = jax.block_until_ready(snake_beta(x, alpha, beta, alpha_logscale=False))
    ref = snake_beta_ref(x, alpha, beta, alpha_logscale=False)
    assert out.shape == (B, C, T)
    assert jnp.allclose(out, ref, atol=1e-5, rtol=1e-5), "f32 mismatch vs reference"

    # alpha_logscale path (exp of params, done once in the wrapper).
    a_log = 0.1 * jax.random.normal(k1, (C,), jnp.float32)
    b_log = 0.1 * jax.random.normal(k2, (C,), jnp.float32)
    out2 = jax.block_until_ready(snake_beta(x, a_log, b_log, alpha_logscale=True))
    ref2 = snake_beta_ref(x, a_log, b_log, alpha_logscale=True)
    assert jnp.allclose(out2, ref2, atol=1e-5, rtol=1e-5), "logscale mismatch vs reference"

    # bf16 I/O path (f32 math inside, bf16 on the wire).
    xb = x.astype(jnp.bfloat16)
    out3 = jax.block_until_ready(snake_beta(xb, alpha, beta, alpha_logscale=False))
    ref3 = snake_beta_ref(xb, alpha, beta, alpha_logscale=False)
    assert out3.dtype == jnp.bfloat16 and out3.shape == (B, C, T)
    assert jnp.allclose(out3.astype(jnp.float32), ref3.astype(jnp.float32),
                        atol=2e-2, rtol=2e-2), "bf16 mismatch vs reference"

    # Ragged / multi-block path: forced small tiles so the grid has several
    # blocks and the last T block is clipped (no wrapper pad / output slice).
    B2, C2, T2 = 2, 12, 300
    x4 = jax.random.normal(k3, (B2, C2, T2), dtype=jnp.float32)
    a4 = 1.0 + 0.2 * jax.random.normal(k1, (C2,), jnp.float32)
    b4 = 1.0 + 0.2 * jax.random.normal(k2, (C2,), jnp.float32)
    out4 = jax.block_until_ready(snake_beta(x4, a4, b4, r_block=8, t_block=128))
    ref4 = snake_beta_ref(x4, a4, b4)
    assert jnp.allclose(out4, ref4, atol=1e-5, rtol=1e-5), "ragged-grid mismatch vs reference"

    print("KERNEL_OK")
</pallas_src>

<mosaic_0001>
module attributes {stable_mosaic.version = 11 : i64} {
  func.func @_snake_beta_kernel(%arg0: i32, %arg1: i32, %arg2: memref<8x1xf32, #tpu.memory_space<vmem>>, %arg3: memref<8x1xf32, #tpu.memory_space<vmem>>, %arg4: memref<8x16xf32, #tpu.memory_space<vmem>>, %arg5: memref<8x16xf32, #tpu.memory_space<vmem>>) attributes {dimension_semantics = [#tpu.dimension_semantics<parallel>, #tpu.dimension_semantics<parallel>], iteration_bounds = array<i64: 1, 1>, scalar_prefetch = 0 : i64, scratch_operands = 0 : i64, tpu.core_type = #tpu.core_type<tc>, window_params = [{transform_indices = @transform_0, window_bounds = array<i64: 8, 1>}, {transform_indices = @transform_1, window_bounds = array<i64: 8, 1>}, {transform_indices = @transform_2, window_bounds = array<i64: 8, 16>}, {transform_indices = @transform_3, window_bounds = array<i64: 8, 16>}]} {
    %c0 = arith.constant 0 : index
    %c0_0 = arith.constant 0 : index
    %0 = vector.load %arg2[%c0, %c0_0] : memref<8x1xf32, #tpu.memory_space<vmem>>, vector<8x1xf32>
    %c0_1 = arith.constant 0 : index
    %c0_2 = arith.constant 0 : index
    %1 = vector.load %arg3[%c0_1, %c0_2] : memref<8x1xf32, #tpu.memory_space<vmem>>, vector<8x1xf32>
    %c0_3 = arith.constant 0 : index
    %c0_4 = arith.constant 0 : index
    %2 = vector.load %arg4[%c0_3, %c0_4] : memref<8x16xf32, #tpu.memory_space<vmem>>, vector<8x16xf32>
    %3 = vector.broadcast %1 : vector<8x1xf32> to vector<8x16xf32>
    %4 = arith.addf %2, %3 : vector<8x16xf32>
    %5 = vector.broadcast %0 : vector<8x1xf32> to vector<8x16xf32>
    %6 = arith.mulf %5, %2 : vector<8x16xf32>
    %7 = math.cos %6 : vector<8x16xf32>
    %8 = vector.broadcast %1 : vector<8x1xf32> to vector<8x16xf32>
    %9 = arith.mulf %8, %7 : vector<8x16xf32>
    %10 = arith.subf %4, %9 : vector<8x16xf32>
    %c0_5 = arith.constant 0 : index
    %c0_6 = arith.constant 0 : index
    %11 = vector.load %arg5[%c0_5, %c0_6] : memref<8x16xf32, #tpu.memory_space<vmem>>, vector<8x16xf32>
    tpu.vector_store %arg5[%c0_5, %c0_6], %10 {strides = array<i32>} : memref<8x16xf32, #tpu.memory_space<vmem>>, vector<8x16xf32>,
    return
  }
  func.func @transform_0(%arg0: i32, %arg1: i32) -> (i32, i32) {
    %c0_i32 = arith.constant 0 : i32
    %c0_i32_0 = arith.constant 0 : i32
    return %arg0, %c0_i32 : i32, i32
  }
  func.func @transform_1(%arg0: i32, %arg1: i32) -> (i32, i32) {
    %c0_i32 = arith.constant 0 : i32
    %c0_i32_0 = arith.constant 0 : i32
    return %arg0, %c0_i32 : i32, i32
  }
  func.func @transform_2(%arg0: i32, %arg1: i32) -> (i32, i32) {
    %c0_i32 = arith.constant 0 : i32
    return %arg0, %arg1 : i32, i32
  }
  func.func @transform_3(%arg0: i32, %arg1: i32) -> (i32, i32) {
    %c0_i32 = arith.constant 0 : i32
    return %arg0, %arg1 : i32, i32
  }
}

</mosaic_0001>

<bundles_post_ra>
// kernel: tpu_custom_call.1
= control target key start
LH: loop header
LB: loop body
LE: loop exit
PB: predicated region body
PF: predicated region fallthrough
CT: control target
= control target key end

     0   :  { %v196_v1 = vmov 0   ;;  %s270_s0 = inlined_call_operand.vmem [shape: f32[8,1], index: 0, kind: input, shape index: {}]   ;;  %s271_s1 = inlined_call_operand.vmem [shape: f32[8,1], index: 1, kind: input, shape index: {}]   ;;  %s272_s2 = inlined_call_operand.vmem [shape: f32[8,16], index: 2, kind: input, shape index: {}]   ;;  %s273_s3 = inlined_call_operand.hbm [shape: f32[8,16], index: 3, kind: output, shape index: {}]  }
   0x1   :  { %v15_v0 = vld [vmem:[%s270_s0] sm:$0xff]  ;;  %167 = vset.pattern.permute.xlu0 %v196_v1 }
   0x2   :  { %8 = vsyncpa [#allocation3], 0  ;;  %26 = vperm.xlu0 %167, %v15_v0   ;;  %v16_v2 = vld [vmem:[%s271_s1] sm:$0xff]  ;;  %v197_v17 = vmov 2102212464   ;;  %s203_s0 = smov [#allocation2]  }
   0x3   :  { %v233_v3 = vld [vmem:[%s272_s2] sm:$0xff]  ;;  %v198_v19 = vmov 920167782   ;;  %v199_v23 = vmov 1326507024   ;;  %s143_s1 = sshll.u32 %s203_s0, 4  ;;  %s144_s1 = int_to_ptr.vmem [resolvable:$true] %s143_s1 }
   0x4   :  { %v200_v25 = vmov 683565275   ;;  %v201_v27 = vmov 2475754826   ;;  %v202_v30 = vmov 2131351028   ;;  %p177_p1 = scmp.lt.s32.totalorder %s144_s1, %s144_s1 }
   0x5   :  { %vm135_vm13 = vcmask 130048   ;;  %s172_s2 = scalar_lea.vmem %s144_s1, 128 }
   0x6   :  { %20 = vperm.xlu0 %167, %v16_v2   ;;  %p173_p0 = scmp.ne.s32.totalorder %s144_s1, %s172_s2  ;;  %p178_p2 = scmp.lt.s32.totalorder %s172_s2, %s172_s2 }
   0x8   :  { %p179_p3 = por %p178_p2, %p177_p1 }
   0xa   :  { %p180_p4 = pnand %p179_p3, %p173_p0 }
  0x81   :  { %v27_v4 = vpop.permute.xlu0 %26 }
  0x82   :  { %v236_v5 = vmul.f32 %v27_v4, %v233_v3 }
  0x84   :  { %v33_v6 = vand.u32 2139095040, %v236_v5  ;;  %v30_v7 = vand.u32 2147483647, %v236_v5  ;;  %vm32_vm7 = vcmp.lt.s32.totalorder %v236_v5, 0  ;;  %vm122_vm12 = vweird.f32 %v236_v5 }
  0x86   :  { %v34_v8 = vshrl.u32 %v33_v6, 23  ;;  %v37_v10 = vand.u32 8388607, %v30_v7  ;;  %vm31_vm8 = vcmp.le.f32.partialorder %v30_v7, 0.7853982 }
  0x88   :  { %v151_v9 = vadd.s32 4294967169, %v34_v8  ;;  %v38_v13 = vor.u32 8388608, %v37_v10 }
  0x8a   :  { %v40_v11 = vadd.s32 1, %v151_v9  ;;  %v78_v21 = vshll.u32 %v38_v13, 8 }
  0x8c   :  { %vm41_vm0 = vcmp.gt.s32.totalorder %v40_v11, 0 }
  0x8d   :  { %v42_v12 = vsel %vm41_vm0, %v40_v11, 0 }
  0x8e   :  { %v44_v14 = vand.u32 31, %v42_v12  ;;  %v43_v15 = vshrl.u32 %v42_v12, 5 }
  0x90   :  { %v45_v16 = vsub.s32 32, %v44_v14  ;;  %v56_v18 = vshll.u32 %v197_v17, %v44_v14  ;;  %v59_v20 = vshll.u32 %v198_v19, %v44_v14  ;;  %v47_v26 = vshll.u32 %v200_v25, %v44_v14 }
  0x91   :  { %v50_v29 = vshll.u32 %v201_v27, %v44_v14  ;;  %v53_v32 = vshll.u32 %v202_v30, %v44_v14  ;;  %vm65_vm1 = vcmp.lt.s32.totalorder %v43_v15, 4  ;;  %vm62_vm2 = vcmp.lt.s32.totalorder %v43_v15, 1 }
  0x92   :  { %v57_v22 = vshrl.u32 %v198_v19, %v45_v16  ;;  %v60_v24 = vshrl.u32 %v199_v23, %v45_v16  ;;  %v48_v28 = vshrl.u32 %v201_v27, %v45_v16  ;;  %v51_v31 = vshrl.u32 %v202_v30, %v45_v16 }
  0x93   :  { %v54_v33 = vshrl.u32 %v197_v17, %v45_v16  ;;  %v46_v37 = vshrl.u32 %v200_v25, %v45_v16  ;;  %vm63_vm3 = vcmp.lt.s32.totalorder %v43_v15, 2  ;;  %vm64_vm4 = vcmp.lt.s32.totalorder %v43_v15, 3 }
  0x94   :  { %v58_v34 = vor.u32 %v57_v22, %v56_v18  ;;  %v61_v35 = vor.u32 %v60_v24, %v59_v20  ;;  %v49_v36 = vor.u32 %v48_v28, %v47_v26  ;;  %v52_v38 = vor.u32 %v51_v31, %v50_v29 }
  0x95   :  { %v55_v39 = vor.u32 %v54_v33, %v53_v32  ;;  %v21_v33 = vpop.permute.xlu0 %20 }
  0x96   :  { %v71_v40 = vsel %vm65_vm1, %v58_v34, 920167782  ;;  %v75_v41 = vsel %vm65_vm1, %v61_v35, 1326507024  ;;  %v70_v43 = vsel %vm62_vm2, %v49_v36, %v52_v38  ;;  %v66_v46 = vsel %vm62_vm2, %v46_v37, %v49_v36 }
  0x97   :  { %v67_v42 = vsel %vm65_vm1, %v55_v39, 2102212464  ;;  %v72_v44 = vsel %vm64_vm4, %v55_v39, %v71_v40  ;;  %v74_v45 = vsel %vm62_vm2, %v52_v38, %v55_v39  ;;  %v76_v49 = vsel %vm64_vm4, %v58_v34, %v75_v41 }
  0x98   :  { %v68_v47 = vsel %vm64_vm4, %v52_v38, %v67_v42  ;;  %v73_v48 = vsel %vm63_vm3, %v70_v43, %v72_v44  ;;  %v77_v50 = vsel %vm63_vm3, %v74_v45, %v76_v49  ;;  %v23_v35 = vadd.f32 %v21_v33, %v233_v3 }
  0x99   :  { %v242_v51 = vmul.u32.u64.low %v78_v21, %v73_v48  ;;  %v243_v52 = vmul.u32.u64.high %v78_v21, %v73_v48, %v242_v51  ;;  %v245_v53 = vmul.u32.u64.low %v78_v21, %v77_v50  ;;  %v246_v54 = vmul.u32.u64.high %v78_v21, %v77_v50, %v245_v53 }
  0x9a   :  { %v69_v55 = vsel %vm63_vm3, %v66_v46, %v68_v47 }
  0x9b   :  { %v88_v56 = vadd.s32 1, %v243_v52  ;;  %v85_v57 = vmul.u32 %v78_v21, %v69_v55  ;;  %vm87_vm5 = vc.u32 %v246_v54, %v242_v51  ;;  %v86_v8 = vadd.s32 %v242_v51, %v246_v54 }
  0x9d   :  { %v89_v58 = vsel %vm87_vm5, %v88_v56, %v243_v52 }
  0x9e   :  { %v90_v59 = vadd.s32 %v89_v58, %v85_v57 }
  0xa0   :  { %v91_v60 = vadd.s32 536870912, %v90_v59 }
  0xa2   :  { %v92_v61 = vshrl.u32 %v91_v60, 30 }
  0xa4   :  { %v93_v62 = vshll.u32 %v92_v61, 30  ;;  %v116_v22 = vsub.s32 4, %v92_v61 }
  0xa6   :  { %v94_v63 = vsub.s32 %v90_v59, %v93_v62  ;;  %v117_v24 = vsel %vm32_vm7, %v116_v22, %v92_v61 }
  0xa7   :  { %v119_v25 = vsel %vm31_vm8, 0, %v117_v24 }
  0xa8   :  { %v96_v0 = vsub.s32 0, %v94_v63  ;;  %v123_v26 = vand.u32 3, %v119_v25 }
  0xaa   :  { %v152_v1 = vmin.u32 %v96_v0, %v94_v63  ;;  %vm128_vm9 = vcmp.eq.s32.totalorder %v123_v26, 2  ;;  %vm125_vm10 = vcmp.eq.s32.totalorder %v123_v26, 0  ;;  %vm124_vm11 = vcmp.lt.s32.totalorder %v123_v26, 2 }
  0xac   :  { %v98_v2 = vclz %v152_v1 }
  0xae   :  { %v153_v4 = vadd.s32 4294967294, %v98_v2 }
  0xb0   :  { %vm154_vm6 = vcmp.lt.s32.totalorder %v153_v4, 0 }
  0xb1   :  { %v101_v6 = vsel %vm154_vm6, 0, %v153_v4 }
  0xb2   :  { %v102_v9 = vsub.s32 32, %v101_v6  ;;  %v106_v10 = vsub.s32 4294967266, %v101_v6  ;;  %v103_v11 = vshll.u32 %v94_v63, %v101_v6 }
  0xb4   :  { %v104_v12 = vshrl.u32 %v86_v8, %v102_v9  ;;  %v107_v13 = vadd.s32 127, %v106_v10 }
  0xb6   :  { %v105_v14 = vor.u32 %v104_v12, %v103_v11  ;;  %v108_v15 = vshll.u32 %v107_v13, 23 }
  0xb8   :  { %v109_v16 = vor.u32 4788187, %v108_v15  ;;  %v112_v18 = vcvt.s32.f32 %v105_v14 }
  0xba   :  { %v110_v17 = vand.u32 2147483647, %v109_v16 }
  0xbc   :  { %v113_v19 = vmul.f32 %v112_v18, %v110_v17 }
  0xbe   :  { %v114_v20 = vxor.u32 2147483648, %v113_v19 }
  0xc0   :  { %v115_v21 = vsel %vm32_vm7, %v114_v20, %v113_v19 }
  0xc1   :  { %v118_v23 = vsel %vm31_vm8, %v236_v5, %v115_v21 }
  0xc2   :  { %168 = vcosq.f32 %v118_v23 }
  0xc3   :  { %170 = vsinq.f32 %v118_v23 }
  0xcc   :  { %v169_v27 = vpop.eup %168 }
  0xcd   :  { %v171_v28 = vpop.eup %170  ;;  %v129_v29 = vxor.u32 2147483648, %v169_v27 }
  0xce   :  { %v126_v30 = vxor.u32 2147483648, %v171_v28 }
  0xcf   :  { %v130_v31 = vsel %vm128_vm9, %v129_v29, %v171_v28 }
  0xd0   :  { %v127_v32 = vsel %vm125_vm10, %v169_v27, %v126_v30 }
  0xd1   :  { %v131_v7 = vsel %vm124_vm11, %v127_v32, %v130_v31 }
  0xd2   :  { %v132_v34 = vsel %vm122_vm12, nan, %v131_v7 }
  0xd3   :  { %v133_v36 = vmul.f32 %v132_v34, %v21_v33 }
  0xd5   :  { %v134_v37 = vsub.f32 %v23_v35, %v133_v36 }
  0xd7   :  { %136 = vst.msk [vmem:[#allocation2] sm:$0xff] %vm135_vm13, %v134_v37 }
  0xd8   :  { %183 = shalt.err (!%p180_p4)
}
  0xd9   :  { %s184_s20 = scalar_lea.hbm %s273_s3, 128 }
  0xda   :  { %p185_p5 = scmp.ne.s32.totalorder %s273_s3, %s184_s20  ;;  %p188_p6 = scmp.lt.u32.totalorder %s184_s20, %s273_s3 }
  0xdc   :  { %p190_p7 = pnand %p188_p6, %p185_p5 }
  0xde   :  { %193 = shalt.err (!%p190_p7)
}
  0xdf   :  { %146 = dma.vmem_to_hbm [thread:$0]  %s144_s1, 128, %s273_s3, [#allocation3]  }
  0xe0   :  { %194 = dma.done.wait [#allocation3], 128  }
  0xe1   :  { %195 = vsyncadd [#allocation3], 4294967168 }
  0xe2   :  { %150 = vsyncpa [#allocation3], 1 }

</bundles_post_ra>
